<compile_context>
chip_gen: v6e
topology: v6e:2x2x1
jax: 0.10.0
libtpu: 0.0.40
codegen_flags: <defaults>
</compile_context>

<pallas_src>
import jax
import jax.numpy as jnp
import numpy as np
from jax import lax
from jax.experimental import pallas as pl
from jax.experimental.pallas import tpu as pltpu

N1 = 3            # x1 is (N1, N1)
N2 = 5            # x2 is (N1, N2)
STEPS = 5
FC_IN = N1 * N2   # 15, matches torch.nn.Linear(15, 1)

# padded (sublane, lane) tile shapes
P_M = 8
P_K = 8
P_N = 128


def _pad2d(a, rows, cols):
    out = jnp.zeros((rows, cols), a.dtype)
    return out.at[: a.shape[0], : a.shape[1]].set(a)


def fused_kernel(x1_ref, x2_ref, w_ref, b_ref, fc_ref, v2f_ref):
    """Whole forward in one kernel.

    x1_ref: (8,8)   zero-padded (3,3)
    x2_ref: (8,128) zero-padded (3,5)
    w_ref : (8,128) fc weight reshaped to (3,5) and zero-padded (same layout
            as the activation tiles, so an elementwise mul + full sum equals
            the 15-wide dot product exactly).
    b_ref : (1,) bias in SMEM
    fc_ref: (8,128) out; rows 0..4, lanes 0..1 hold the (5,2,1) fc result
    v2f_ref:(8,128) out; rows 0..2, lanes 0..4 hold the final v2 = x1^5 @ v1
    """
    x1 = x1_ref[...]
    x2 = x2_ref[...]
    w = w_ref[...]
    b = b_ref[0]

    # Powers of x1 so the dependent MXU chain is ~3 deep instead of 6.
    x1sq = jnp.dot(x1, x1, preferred_element_type=jnp.float32)       # x1^2
    x1qd = jnp.dot(x1sq, x1sq, preferred_element_type=jnp.float32)   # x1^4

    v1 = jnp.dot(x1, x2, preferred_element_type=jnp.float32)         # v1 = v2_0
    v2_1 = jnp.dot(x1, v1, preferred_element_type=jnp.float32)       # x1^1 @ v1
    v2_2 = jnp.dot(x1sq, v1, preferred_element_type=jnp.float32)     # x1^2 @ v1
    v2_3 = jnp.dot(x1sq, v2_1, preferred_element_type=jnp.float32)   # x1^3 @ v1
    v2_4 = jnp.dot(x1qd, v1, preferred_element_type=jnp.float32)     # x1^4 @ v1
    v2_5 = jnp.dot(x1qd, v2_1, preferred_element_type=jnp.float32)   # x1^5 @ v1

    v2f_ref[...] = v2_5

    # Linear(15, 1) as elementwise multiply (VALU) + full reduce (XLU):
    # zero padding keeps the (8,128) tile sum equal to the 15-wide dot.
    def dot_w(v):
        return jnp.sum(v * w)

    d = [dot_w(v1), dot_w(v2_1), dot_w(v2_2), dot_w(v2_3), dot_w(v2_4)]
    # torch semantics: result[s] = [flatten(v1), flatten(v2_s)]; v2_0 == v1.

    rows = lax.broadcasted_iota(jnp.int32, (P_M, P_N), 0)
    cols = lax.broadcasted_iota(jnp.int32, (P_M, P_N), 1)
    out = jnp.where((rows < STEPS) & (cols == 0), d[0] + b, 0.0)      # fc(v1)
    for s in range(STEPS):                                            # fc(v2_s)
        out = jnp.where((rows == s) & (cols == 1), d[s] + b, out)
    fc_ref[...] = out


@jax.jit
def model_forward(x1, x2, fc_w, fc_b):
    x1p = _pad2d(x1, P_M, P_K)
    x2p = _pad2d(x2, P_K, P_N)
    # fc weight in the same padded tile layout as the (3,5) activations.
    wp = _pad2d(fc_w.reshape(N1, N2), P_M, P_N)

    fcp, v2fp = pl.pallas_call(
        fused_kernel,
        out_shape=(
            jax.ShapeDtypeStruct((P_M, P_N), jnp.float32),
            jax.ShapeDtypeStruct((P_M, P_N), jnp.float32),
        ),
        in_specs=[
            pl.BlockSpec((P_M, P_K), lambda: (0, 0)),
            pl.BlockSpec((P_K, P_N), lambda: (0, 0)),
            pl.BlockSpec((P_M, P_N), lambda: (0, 0)),
            pl.BlockSpec(memory_space=pltpu.MemorySpace.SMEM),
        ],
        out_specs=(
            pl.BlockSpec((P_M, P_N), lambda: (0, 0)),
            pl.BlockSpec((P_M, P_N), lambda: (0, 0)),
        ),
    )(x1p, x2p, wp, fc_b)

    fc_out = fcp[:STEPS, :2].reshape(STEPS, 2, 1)   # self.fc(result) -> (5,2,1)
    v2_final = v2fp[:N1, :N2]                       # final v2 -> (3,5)
    return fc_out, v2_final


def reference(x1, x2, fc_w, fc_b):
    v1 = x1 @ x2
    v2 = v1
    rows = []
    for _ in range(STEPS):
        rows.append(jnp.concatenate([v1[None], v2[None]], axis=1))  # (1, 6, 5)
        v2 = x1 @ v2
    res = jnp.stack(rows).reshape(STEPS, 2, FC_IN)
    return res @ fc_w.T + fc_b, v2


if __name__ == "__main__":
    key = jax.random.PRNGKey(0)
    k1, k2, k3, k4 = jax.random.split(key, 4)
    x1 = jax.random.normal(k1, (N1, N1), dtype=jnp.float32)
    x2 = jax.random.normal(k2, (N1, N2), dtype=jnp.float32)
    fc_w = jax.random.normal(k3, (1, FC_IN), dtype=jnp.float32) * 0.1
    fc_b = jax.random.normal(k4, (1,), dtype=jnp.float32) * 0.1

    fc_out, v2_final = model_forward(x1, x2, fc_w, fc_b)
    jax.block_until_ready((fc_out, v2_final))

    ref_fc, ref_v2 = reference(x1, x2, fc_w, fc_b)
    np.testing.assert_allclose(np.asarray(fc_out), np.asarray(ref_fc),
                               rtol=1e-4, atol=1e-5)
    np.testing.assert_allclose(np.asarray(v2_final), np.asarray(ref_v2),
                               rtol=1e-4, atol=1e-5)

    print("KERNEL_OK")
</pallas_src>

<mosaic_0001>
module attributes {stable_mosaic.version = 11 : i64} {
  func.func @fused_kernel(%arg0: memref<8x8xf32, #tpu.memory_space<vmem>>, %arg1: memref<8x128xf32, #tpu.memory_space<vmem>>, %arg2: memref<8x128xf32, #tpu.memory_space<vmem>>, %arg3: memref<1xf32, #tpu.memory_space<smem>>, %arg4: memref<8x128xf32, #tpu.memory_space<vmem>>, %arg5: memref<8x128xf32, #tpu.memory_space<vmem>>) attributes {dimension_semantics = [], scalar_prefetch = 0 : i64, scratch_operands = 0 : i64, tpu.core_type = #tpu.core_type<tc>} {
    %c0 = arith.constant 0 : index
    %c0_0 = arith.constant 0 : index
    %0 = vector.load %arg0[%c0, %c0_0] : memref<8x8xf32, #tpu.memory_space<vmem>>, vector<8x8xf32>
    %c0_1 = arith.constant 0 : index
    %c0_2 = arith.constant 0 : index
    %1 = vector.load %arg1[%c0_1, %c0_2] : memref<8x128xf32, #tpu.memory_space<vmem>>, vector<8x128xf32>
    %c0_3 = arith.constant 0 : index
    %c0_4 = arith.constant 0 : index
    %2 = vector.load %arg2[%c0_3, %c0_4] : memref<8x128xf32, #tpu.memory_space<vmem>>, vector<8x128xf32>
    %c0_5 = arith.constant 0 : index
    %3 = memref.load %arg3[%c0_5] : memref<1xf32, #tpu.memory_space<smem>>
    %cst = arith.constant dense<0.000000e+00> : vector<8x8xf32>
    %4 = tpu.matmul %0, %0, %cst {dimension_numbers = #tpu.dot_dimension_numbers<[1], [0], [0], [1], [0, 0, 1, 1], [], []>} : vector<8x8xf32>, vector<8x8xf32>, vector<8x8xf32> -> vector<8x8xf32>
    %cst_6 = arith.constant dense<0.000000e+00> : vector<8x8xf32>
    %5 = tpu.matmul %4, %4, %cst_6 {dimension_numbers = #tpu.dot_dimension_numbers<[1], [0], [0], [1], [0, 0, 1, 1], [], []>} : vector<8x8xf32>, vector<8x8xf32>, vector<8x8xf32> -> vector<8x8xf32>
    %cst_7 = arith.constant dense<0.000000e+00> : vector<8x128xf32>
    %6 = tpu.matmul %0, %1, %cst_7 {dimension_numbers = #tpu.dot_dimension_numbers<[1], [0], [0], [1], [0, 0, 1, 1], [], []>} : vector<8x8xf32>, vector<8x128xf32>, vector<8x128xf32> -> vector<8x128xf32>
    %cst_8 = arith.constant dense<0.000000e+00> : vector<8x128xf32>
    %7 = tpu.matmul %0, %6, %cst_8 {dimension_numbers = #tpu.dot_dimension_numbers<[1], [0], [0], [1], [0, 0, 1, 1], [], []>} : vector<8x8xf32>, vector<8x128xf32>, vector<8x128xf32> -> vector<8x128xf32>
    %cst_9 = arith.constant dense<0.000000e+00> : vector<8x128xf32>
    %8 = tpu.matmul %4, %6, %cst_9 {dimension_numbers = #tpu.dot_dimension_numbers<[1], [0], [0], [1], [0, 0, 1, 1], [], []>} : vector<8x8xf32>, vector<8x128xf32>, vector<8x128xf32> -> vector<8x128xf32>
    %cst_10 = arith.constant dense<0.000000e+00> : vector<8x128xf32>
    %9 = tpu.matmul %4, %7, %cst_10 {dimension_numbers = #tpu.dot_dimension_numbers<[1], [0], [0], [1], [0, 0, 1, 1], [], []>} : vector<8x8xf32>, vector<8x128xf32>, vector<8x128xf32> -> vector<8x128xf32>
    %cst_11 = arith.constant dense<0.000000e+00> : vector<8x128xf32>
    %10 = tpu.matmul %5, %6, %cst_11 {dimension_numbers = #tpu.dot_dimension_numbers<[1], [0], [0], [1], [0, 0, 1, 1], [], []>} : vector<8x8xf32>, vector<8x128xf32>, vector<8x128xf32> -> vector<8x128xf32>
    %cst_12 = arith.constant dense<0.000000e+00> : vector<8x128xf32>
    %11 = tpu.matmul %5, %7, %cst_12 {dimension_numbers = #tpu.dot_dimension_numbers<[1], [0], [0], [1], [0, 0, 1, 1], [], []>} : vector<8x8xf32>, vector<8x128xf32>, vector<8x128xf32> -> vector<8x128xf32>
    %c0_13 = arith.constant 0 : index
    %c0_14 = arith.constant 0 : index
    %12 = vector.load %arg5[%c0_13, %c0_14] : memref<8x128xf32, #tpu.memory_space<vmem>>, vector<8x128xf32>
    tpu.vector_store %arg5[%c0_13, %c0_14], %11 {strides = array<i32>} : memref<8x128xf32, #tpu.memory_space<vmem>>, vector<8x128xf32>,
    %13 = arith.mulf %6, %2 : vector<8x128xf32>
    %14 = vector.shape_cast %13 : vector<8x128xf32> to vector<1x8x128xf32>
    %cst_15 = arith.constant dense<0.000000e+00> : vector<1xf32>
    %15 = vector.multi_reduction <add>, %14, %cst_15 [1, 2] : vector<1x8x128xf32> to vector<1xf32>
    %16 = vector.shape_cast %15 : vector<1xf32> to vector<1x1x1xf32>
    %17 = vector.extract %16[0, 0, 0] : f32 from vector<1x1x1xf32>
    %18 = arith.mulf %7, %2 : vector<8x128xf32>
    %19 = vector.shape_cast %18 : vector<8x128xf32> to vector<1x8x128xf32>
    %cst_16 = arith.constant dense<0.000000e+00> : vector<1xf32>
    %20 = vector.multi_reduction <add>, %19, %cst_16 [1, 2] : vector<1x8x128xf32> to vector<1xf32>
    %21 = vector.shape_cast %20 : vector<1xf32> to vector<1x1x1xf32>
    %22 = vector.extract %21[0, 0, 0] : f32 from vector<1x1x1xf32>
    %23 = arith.mulf %8, %2 : vector<8x128xf32>
    %24 = vector.shape_cast %23 : vector<8x128xf32> to vector<1x8x128xf32>
    %cst_17 = arith.constant dense<0.000000e+00> : vector<1xf32>
    %25 = vector.multi_reduction <add>, %24, %cst_17 [1, 2] : vector<1x8x128xf32> to vector<1xf32>
    %26 = vector.shape_cast %25 : vector<1xf32> to vector<1x1x1xf32>
    %27 = vector.extract %26[0, 0, 0] : f32 from vector<1x1x1xf32>
    %28 = arith.mulf %9, %2 : vector<8x128xf32>
    %29 = vector.shape_cast %28 : vector<8x128xf32> to vector<1x8x128xf32>
    %cst_18 = arith.constant dense<0.000000e+00> : vector<1xf32>
    %30 = vector.multi_reduction <add>, %29, %cst_18 [1, 2] : vector<1x8x128xf32> to vector<1xf32>
    %31 = vector.shape_cast %30 : vector<1xf32> to vector<1x1x1xf32>
    %32 = vector.extract %31[0, 0, 0] : f32 from vector<1x1x1xf32>
    %33 = arith.mulf %10, %2 : vector<8x128xf32>
    %34 = vector.shape_cast %33 : vector<8x128xf32> to vector<1x8x128xf32>
    %cst_19 = arith.constant dense<0.000000e+00> : vector<1xf32>
    %35 = vector.multi_reduction <add>, %34, %cst_19 [1, 2] : vector<1x8x128xf32> to vector<1xf32>
    %36 = vector.shape_cast %35 : vector<1xf32> to vector<1x1x1xf32>
    %37 = vector.extract %36[0, 0, 0] : f32 from vector<1x1x1xf32>
    %38 = tpu.iota {dimensions = array<i32: 0>} : vector<8x128xi32>
    %39 = tpu.iota {dimensions = array<i32: 1>} : vector<8x128xi32>
    %c5_i32 = arith.constant 5 : i32
    %40 = vector.broadcast %c5_i32 : i32 to vector<8x128xi32>
    %41 = arith.cmpi slt, %38, %40 : vector<8x128xi32>
    %c0_i32 = arith.constant 0 : i32
    %42 = vector.broadcast %c0_i32 : i32 to vector<8x128xi32>
    %43 = arith.cmpi eq, %39, %42 : vector<8x128xi32>
    %44 = arith.andi %41, %43 : vector<8x128xi1>
    %45 = arith.addf %17, %3 : f32
    %cst_20 = arith.constant 0.000000e+00 : f32
    %46 = vector.broadcast %45 : f32 to vector<8x128xf32>
    %47 = vector.broadcast %cst_20 : f32 to vector<8x128xf32>
    %48 = arith.select %44, %46, %47 : vector<8x128xi1>, vector<8x128xf32>
    %c0_i32_21 = arith.constant 0 : i32
    %49 = vector.broadcast %c0_i32_21 : i32 to vector<8x128xi32>
    %50 = arith.cmpi eq, %38, %49 : vector<8x128xi32>
    %c1_i32 = arith.constant 1 : i32
    %51 = vector.broadcast %c1_i32 : i32 to vector<8x128xi32>
    %52 = arith.cmpi eq, %39, %51 : vector<8x128xi32>
    %53 = arith.andi %50, %52 : vector<8x128xi1>
    %54 = arith.addf %17, %3 : f32
    %55 = vector.broadcast %54 : f32 to vector<8x128xf32>
    %56 = arith.select %53, %55, %48 : vector<8x128xi1>, vector<8x128xf32>
    %c1_i32_22 = arith.constant 1 : i32
    %57 = vector.broadcast %c1_i32_22 : i32 to vector<8x128xi32>
    %58 = arith.cmpi eq, %38, %57 : vector<8x128xi32>
    %c1_i32_23 = arith.constant 1 : i32
    %59 = vector.broadcast %c1_i32_23 : i32 to vector<8x128xi32>
    %60 = arith.cmpi eq, %39, %59 : vector<8x128xi32>
    %61 = arith.andi %58, %60 : vector<8x128xi1>
    %62 = arith.addf %22, %3 : f32
    %63 = vector.broadcast %62 : f32 to vector<8x128xf32>
    %64 = arith.select %61, %63, %56 : vector<8x128xi1>, vector<8x128xf32>
    %c2_i32 = arith.constant 2 : i32
    %65 = vector.broadcast %c2_i32 : i32 to vector<8x128xi32>
    %66 = arith.cmpi eq, %38, %65 : vector<8x128xi32>
    %c1_i32_24 = arith.constant 1 : i32
    %67 = vector.broadcast %c1_i32_24 : i32 to vector<8x128xi32>
    %68 = arith.cmpi eq, %39, %67 : vector<8x128xi32>
    %69 = arith.andi %66, %68 : vector<8x128xi1>
    %70 = arith.addf %27, %3 : f32
    %71 = vector.broadcast %70 : f32 to vector<8x128xf32>
    %72 = arith.select %69, %71, %64 : vector<8x128xi1>, vector<8x128xf32>
    %c3_i32 = arith.constant 3 : i32
    %73 = vector.broadcast %c3_i32 : i32 to vector<8x128xi32>
    %74 = arith.cmpi eq, %38, %73 : vector<8x128xi32>
    %c1_i32_25 = arith.constant 1 : i32
    %75 = vector.broadcast %c1_i32_25 : i32 to vector<8x128xi32>
    %76 = arith.cmpi eq, %39, %75 : vector<8x128xi32>
    %77 = arith.andi %74, %76 : vector<8x128xi1>
    %78 = arith.addf %32, %3 : f32
    %79 = vector.broadcast %78 : f32 to vector<8x128xf32>
    %80 = arith.select %77, %79, %72 : vector<8x128xi1>, vector<8x128xf32>
    %c4_i32 = arith.constant 4 : i32
    %81 = vector.broadcast %c4_i32 : i32 to vector<8x128xi32>
    %82 = arith.cmpi eq, %38, %81 : vector<8x128xi32>
    %c1_i32_26 = arith.constant 1 : i32
    %83 = vector.broadcast %c1_i32_26 : i32 to vector<8x128xi32>
    %84 = arith.cmpi eq, %39, %83 : vector<8x128xi32>
    %85 = arith.andi %82, %84 : vector<8x128xi1>
    %86 = arith.addf %37, %3 : f32
    %87 = vector.broadcast %86 : f32 to vector<8x128xf32>
    %88 = arith.select %85, %87, %80 : vector<8x128xi1>, vector<8x128xf32>
    %c0_27 = arith.constant 0 : index
    %c0_28 = arith.constant 0 : index
    %89 = vector.load %arg4[%c0_27, %c0_28] : memref<8x128xf32, #tpu.memory_space<vmem>>, vector<8x128xf32>
    tpu.vector_store %arg4[%c0_27, %c0_28], %88 {strides = array<i32>} : memref<8x128xf32, #tpu.memory_space<vmem>>, vector<8x128xf32>,
    return
  }
}

</mosaic_0001>

<bundles_post_ra>
// kernel: model_forward.1
= control target key start
LH: loop header
LB: loop body
LE: loop exit
PB: predicated region body
PF: predicated region fallthrough
CT: control target
= control target key end

     0   :  { %vm24_vm0 = vcmask 64512   ;;  %v764_v0 = vmov 0.0   ;;  %vm765_vm1 = vmmov 0   ;;  %v645_v60 = vlaneseq  ;;  %s853_s0 = inlined_call_operand.vmem [shape: f32[8,8], index: 0, kind: input, shape index: {}]   ;;  %s854_s1 = inlined_call_operand.vmem [shape: f32[8,128], index: 1, kind: input, shape index: {}]   ;;  %s855_s2 = inlined_call_operand.vmem [shape: f32[8,128], index: 2, kind: input, shape index: {}]   ;;  %s856_s5 = inlined_call_operand.vmem [shape: f32[8,128], index: 5, kind: output, shape index: {1}]   ;;  %s857_s3 = inlined_call_operand.<no memory space> [shape: f32[1], index: 3, kind: input, shape index: {}]   ;;  %s858_s4 = inlined_call_operand.vmem [shape: f32[8,128], index: 4, kind: output, shape index: {0}]  }
   0x1   :  { %712 = vmatprep.subr.mxu0 %v764_v0  ;;  %v20_v1 = vld [vmem:[%s853_s0] sm:$0xff]  ;;  %714 = vmatprep.mubr.msk.f32.mxu0 %vm765_vm1, %v764_v0 }
   0x2   :  { %v21_v2 = vld [vmem:[%s854_s1] sm:$0xff]  ;;  %713 = vmatpush3.msra.mxu0 %v20_v1  ;;  %717 = vmatprep.subr.mxu1 %v764_v0  ;;  %v646_v61 = vshrl.u32 %v645_v60, 7  ;;  %v648_v62 = vand.u32 127, %v645_v60 }
   0x3   :  { %715 = vmatmul.mubr.msk.f32.vlgmr.msra.gmra.mxu0 %vm24_vm0, %v20_v1  ;;  %722 = vmatprep.subr.mxu0 %v764_v0  ;;  %v22_v5 = vld [vmem:[%s855_s2] sm:$0xff] }
   0x4   :  { %723 = vmatpush3.msra.mxu0 %v21_v2  ;;  %724 = vmatprep.mubr.msk.f32.mxu0 %vm765_vm1, %v764_v0  ;;  %vm649_vm2 = vcmp.lt.s32.totalorder %v646_v61, 5  ;;  %vm650_vm3 = vcmp.eq.s32.totalorder %v648_v62, 0  ;;  %vm655_vm5 = vcmp.eq.s32.totalorder %v646_v61, 0  ;;  %vm656_vm6 = vcmp.eq.s32.totalorder %v648_v62, 1 }
   0x5   :  { %719 = vmatprep.mubr.msk.f32.mxu1 %vm765_vm1, %v764_v0  ;;  %732 = vmatprep.subr.mxu0 %v764_v0  ;;  %vm651_vm4 = vmand %vm649_vm2, %vm650_vm3  ;;  %vm659_vm7 = vcmp.eq.s32.totalorder %v646_v61, 1  ;;  %vm664_vm10 = vcmp.eq.s32.totalorder %v646_v61, 2  ;;  %vm669_vm11 = vcmp.eq.s32.totalorder %v646_v61, 3  ;;  %vm674_vm12 = vcmp.eq.s32.totalorder %v646_v61, 4 }
   0x6   :  { %vm657_vm8 = vmand %vm655_vm5, %vm656_vm6 }
   0x7   :  { %725 = vmatmul.mubr.msk.f32.vlgmr.msra.gmra.mxu0 %vm24_vm0, %v20_v1  ;;  %vm835_vm9 = vmand %vm659_vm7, %vm656_vm6 }
   0x8   :  { %734 = vmatprep.mubr.msk.f32.mxu0 %vm765_vm1, %v764_v0  ;;  %vm665_vm13 = vmand %vm664_vm10, %vm656_vm6 }
   0x9   :  { %vm670_vm14 = vmand %vm669_vm11, %vm656_vm6 }
   0xa   :  { %vm675_vm15 = vmand %vm674_vm12, %vm656_vm6 }
  0xc3   :  { %v94_v3 = vpop.f32.mrf.mxu0 }
  0xc4   :  { %718 = vmatpush3.msra.mxu1 %v94_v3 }
  0xc5   :  { %v716_v4 = vpop.f32.mrf.mxu0  ;;  %720 = vmatmul.mubr.msk.f32.vlgmr.msra.gmra.mxu1 %vm24_vm0, %v94_v3  ;;  %727 = vmatprep.subr.mxu1 %v764_v0 }
  0xc6   :  { %729 = vmatprep.mubr.msk.f32.mxu1 %vm765_vm1, %v764_v0 }
  0xc7   :  { %v237_v6 = vpop.f32.mrf.mxu0 }
  0xc8   :  { %728 = vmatpush3.msra.mxu1 %v237_v6  ;;  %733 = vmatpush3.msra.mxu0 %v237_v6  ;;  %v595_v7 = vmul.f32 %v237_v6, %v22_v5 }
  0xc9   :  { %v726_v8 = vpop.f32.mrf.mxu0  ;;  %730 = vmatmul.mubr.msk.f32.vlgmr.msra.gmra.mxu1 %vm24_vm0, %v20_v1  ;;  %735 = vmatmul.mubr.msk.f32.vlgmr.msra.gmra.mxu0 %vm24_vm0, %v94_v3 }
  0xca   :  { %742 = vmatprep.subr.mxu0 %v764_v0  ;;  %596 = vadd.xlane.f32.xlu0 %v595_v7 }
  0xcb   :  { %743 = vmatpush3.msra.mxu0 %v237_v6  ;;  %744 = vmatprep.mubr.msk.f32.mxu0 %vm765_vm1, %v764_v0 }
  0xcc   :  { %737 = vmatprep.subr.mxu1 %v764_v0  ;;  %739 = vmatprep.mubr.msk.f32.mxu1 %vm765_vm1, %v764_v0 }
 0x153   :  { %v597_v9 = vpop.xlane.xlu0 %596 }
 0x154   :  { %v598_v10 = vrot.slane %v597_v9, 4 }
 0x156   :  { %v599_v11 = vadd.f32 %v598_v10, %v597_v9 }
 0x158   :  { %v600_v12 = vrot.slane %v599_v11, 2 }
 0x15a   :  { %v601_v13 = vadd.f32 %v600_v12, %v599_v11 }
 0x15c   :  { %v602_v14 = vrot.slane %v601_v13, 1 }
 0x15e   :  { %v603_v15 = vadd.f32 %v602_v14, %v601_v13 }
 0x160   :  { %752 = vpush %v603_v15 }
 0x185   :  { %v167_v16 = vpop.f32.mrf.mxu1 }
 0x186   :  { %745 = vmatmul.mubr.msk.f32.vlgmr.msra.gmra.mxu0 %vm24_vm0, %v167_v16 }
 0x187   :  { %v721_v17 = vpop.f32.mrf.mxu1 }
 0x189   :  { %v307_v18 = vpop.f32.mrf.mxu1  ;;  %v377_v19 = vpop.f32.mrf.mxu0 }
 0x18a   :  { %738 = vmatpush3.msra.mxu1 %v307_v18  ;;  %v605_v20 = vmul.f32 %v307_v18, %v22_v5  ;;  %v615_v21 = vmul.f32 %v377_v19, %v22_v5 }
 0x18b   :  { %v731_v22 = vpop.f32.mrf.mxu1  ;;  %v736_v23 = vpop.f32.mrf.mxu0  ;;  %740 = vmatmul.mubr.msk.f32.vlgmr.msra.gmra.mxu1 %vm24_vm0, %v94_v3  ;;  %747 = vmatprep.subr.mxu1 %v764_v0 }
 0x18c   :  { %606 = vadd.xlane.f32.xlu0 %v605_v20  ;;  %748 = vmatpush3.msra.mxu1 %v307_v18 }
 0x18d   :  { %616 = vadd.xlane.f32.xlu1 %v615_v21  ;;  %749 = vmatprep.mubr.msk.f32.mxu1 %vm765_vm1, %v764_v0 }
 0x18f   :  { %750 = vmatmul.mubr.msk.f32.vlgmr.msra.gmra.mxu1 %vm24_vm0, %v167_v16 }
 0x191   :  { %s753_s23 = spop %752 }
 0x192   :  { %s652_s25 = sadd.f32 %s753_s23, %s857_s3 }
 0x194   :  { %v653_v63 = vstv %s652_s25 }
 0x195   :  { %v654_v0 = vsel %vm651_vm4, %v653_v63, 0.0 }
 0x196   :  { %v658_v3 = vsel %vm657_vm8, %v653_v63, %v654_v0 }
 0x215   :  { %v607_v24 = vpop.xlane.xlu0 %606 }
 0x216   :  { %v608_v25 = vrot.slane %v607_v24, 4  ;;  %v617_v26 = vpop.xlane.xlu1 %616 }
 0x217   :  { %v618_v27 = vrot.slane %v617_v26, 4 }
 0x218   :  { %v609_v28 = vadd.f32 %v608_v25, %v607_v24 }
 0x219   :  { %v619_v29 = vadd.f32 %v618_v27, %v617_v26 }
 0x21a   :  { %v610_v30 = vrot.slane %v609_v28, 2 }
 0x21b   :  { %v620_v31 = vrot.slane %v619_v29, 2 }
 0x21c   :  { %v611_v32 = vadd.f32 %v610_v30, %v609_v28 }
 0x21d   :  { %v621_v33 = vadd.f32 %v620_v31, %v619_v29 }
 0x21e   :  { %v612_v34 = vrot.slane %v611_v32, 1 }
 0x21f   :  { %v622_v35 = vrot.slane %v621_v33, 1 }
 0x220   :  { %v613_v36 = vadd.f32 %v612_v34, %v611_v32 }
 0x221   :  { %v623_v37 = vadd.f32 %v622_v35, %v621_v33 }
 0x222   :  { %754 = vpush %v613_v36 }
 0x223   :  { %756 = vpush %v623_v37 }
 0x246   :  { %v520_v38 = vpop.f32.mrf.mxu0 }
 0x247   :  { %v635_v39 = vmul.f32 %v520_v38, %v22_v5 }
 0x248   :  { %v746_v40 = vpop.f32.mrf.mxu0 }
 0x249   :  { %636 = vadd.xlane.f32.xlu0 %v635_v39 }
 0x24b   :  { %v447_v41 = vpop.f32.mrf.mxu1 }
 0x24c   :  { %v625_v42 = vmul.f32 %v447_v41, %v22_v5 }
 0x24d   :  { %v741_v43 = vpop.f32.mrf.mxu1 }
 0x24e   :  { %626 = vadd.xlane.f32.xlu1 %v625_v42 }
 0x24f   :  { %v590_v44 = vpop.f32.mrf.mxu1 }
 0x250   :  { %594 = vst [vmem:[%s856_s5] sm:$0xff] %v590_v44 }
 0x251   :  { %v751_v45 = vpop.f32.mrf.mxu1 }
 0x253   :  { %s755_s26 = spop %754 }
 0x254   :  { %s661_s29 = sadd.f32 %s755_s26, %s857_s3  ;;  %s757_s30 = spop %756 }
 0x255   :  { %s666_s8 = sadd.f32 %s757_s30, %s857_s3 }
 0x256   :  { %v662_v2 = vstv %s661_s29 }
 0x257   :  { %v663_v4 = vsel %vm835_vm9, %v662_v2, %v658_v3  ;;  %v667_v5 = vstv %s666_s8 }
 0x258   :  { %v668_v6 = vsel %vm665_vm13, %v667_v5, %v663_v4 }
 0x2d2   :  { %v637_v46 = vpop.xlane.xlu0 %636 }
 0x2d3   :  { %v638_v47 = vrot.slane %v637_v46, 4 }
 0x2d5   :  { %v639_v48 = vadd.f32 %v638_v47, %v637_v46 }
 0x2d7   :  { %v640_v49 = vrot.slane %v639_v48, 2  ;;  %v627_v50 = vpop.xlane.xlu1 %626 }
 0x2d8   :  { %v628_v51 = vrot.slane %v627_v50, 4 }
 0x2d9   :  { %v641_v53 = vadd.f32 %v640_v49, %v639_v48 }
 0x2da   :  { %v629_v52 = vadd.f32 %v628_v51, %v627_v50 }
 0x2db   :  { %v642_v56 = vrot.slane %v641_v53, 1 }
 0x2dc   :  { %v630_v54 = vrot.slane %v629_v52, 2 }
 0x2dd   :  { %v643_v59 = vadd.f32 %v642_v56, %v641_v53 }
 0x2de   :  { %v631_v55 = vadd.f32 %v630_v54, %v629_v52 }
 0x2e0   :  { %v632_v57 = vrot.slane %v631_v55, 1 }
 0x2e2   :  { %v633_v58 = vadd.f32 %v632_v57, %v631_v55 }
 0x2e4   :  { %758 = vpush %v633_v58 }
 0x2e5   :  { %760 = vpush %v643_v59 }
 0x315   :  { %s759_s9 = spop %758 }
 0x316   :  { %s671_s12 = sadd.f32 %s759_s9, %s857_s3  ;;  %s761_s13 = spop %760 }
 0x317   :  { %s676_s16 = sadd.f32 %s761_s13, %s857_s3 }
 0x318   :  { %v672_v7 = vstv %s671_s12 }
 0x319   :  { %v673_v8 = vsel %vm670_vm14, %v672_v7, %v668_v6  ;;  %v677_v9 = vstv %s676_s16 }
 0x31a   :  { %v678_v10 = vsel %vm675_vm15, %v677_v9, %v673_v8 }
 0x31b   :  { %679 = vst [vmem:[%s858_s4] sm:$0xff] %v678_v10 }

</bundles_post_ra>
